<compile_context>
chip_gen: v7x
topology: tpu7x:2x2x1
jax: 0.10.0
libtpu: 0.0.40
codegen_flags: <defaults>
</compile_context>

<pallas_src>
import functools

import jax
import jax.numpy as jnp
from jax.experimental import pallas as pl
from jax.experimental.pallas import tpu as pltpu

_LANES = 128
_TILE_BYTES = 4 * 1024 * 1024   # target bytes per input pipeline buffer


def _round_up(x, m):
    return ((x + m - 1) // m) * m


def _num_core_splits():
    """2-way grid split only on chips with >1 TensorCore; 1 otherwise."""
    try:
        kind = jax.devices()[0].device_kind.lower()
    except Exception:
        return 1
    single_tc = ("v5e", "v5 lite", "v5lite", "v6e", "v6 lite", "v6lite", "trillium")
    if any(s in kind for s in single_tc):
        return 1
    multi_tc = ("v7", "tpu7", "v5p", "v4", "v3", "v2")
    if any(s in kind for s in multi_tc):
        return 2
    return 1  # unknown chip: conservative (no wasted phantom DMA)


def _mae_partial_kernel(p_ref, t_ref, out_ref, acc_ref, *, rows, tile_rows,
                        chunks_per_core, needs_mask):
    c = pl.program_id(0)   # core-split index (parallel)
    j = pl.program_id(1)   # per-core chunk index (arbitrary / reduction)

    @pl.when(j == 0)
    def _():
        acc_ref[...] = jnp.zeros_like(acc_ref)

    # Upcast inside the kernel (keeps HBM traffic at native dtype width).
    diff = jnp.abs(p_ref[...].astype(jnp.float32) - t_ref[...].astype(jnp.float32))

    def _local_reduce(x):
        # (tile_rows, 128) -> (8, 128) tree reduce, accumulated in f32.
        return jnp.sum(x.reshape(tile_rows // 8, 8, _LANES), axis=0)

    if needs_mask:
        # Only blocks that run past `rows` (ragged tail / phantom per-core
        # block) take the masked path; full blocks take the cheap path.
        row_start = (c * chunks_per_core + j) * tile_rows
        full_block = row_start + tile_rows <= rows

        @pl.when(full_block)
        def _():
            acc_ref[...] += _local_reduce(diff)

        @pl.when(jnp.logical_not(full_block))
        def _():
            rid = row_start + jax.lax.broadcasted_iota(jnp.int32, diff.shape, 0)
            # jnp.where (select) drops any NaN/Inf in uninitialized OOB rows.
            acc_ref[...] += _local_reduce(jnp.where(rid < rows, diff, 0.0))
    else:
        acc_ref[...] += _local_reduce(diff)

    @pl.when(j == chunks_per_core - 1)
    def _():
        out_ref[...] = acc_ref[...]


def _mae_loss_impl(pred, target):
    assert pred.shape == target.shape, "pred/target shapes must match"
    n = pred.size

    flat_p = jnp.ravel(pred)
    flat_t = jnp.ravel(target)
    n_pad = _round_up(n, _LANES)
    if n_pad != n:
        # Rare path (element count not a multiple of 128): zero-pad to form the
        # lane-dense 2-D view.  |0 - 0| = 0, so the sum is unchanged.
        flat_p = jnp.pad(flat_p, (0, n_pad - n))
        flat_t = jnp.pad(flat_t, (0, n_pad - n))
    rows = n_pad // _LANES
    p2d = flat_p.reshape(rows, _LANES)
    t2d = flat_t.reshape(rows, _LANES)

    # Tile by bytes, not rows: constant-byte tiles keep the kernel on the HBM
    # roofline regardless of input dtype.  Sublane multiple matches the
    # dtype's packing (8 for f32, 16 for bf16, 32 for int8/fp8).
    itemsize = jnp.dtype(pred.dtype).itemsize
    sublane = {1: 32, 2: 16}.get(itemsize, 8)
    max_tile_rows = max(_TILE_BYTES // (_LANES * itemsize), sublane)
    tile_rows = min(max_tile_rows, _round_up(rows, sublane))
    tile_rows = _round_up(tile_rows, sublane)

    num_splits = _num_core_splits()
    total_chunks = -(-rows // tile_rows)
    if total_chunks < num_splits:
        num_splits = 1
    chunks_per_core = -(-total_chunks // num_splits)
    # Does any block run past `rows` (ragged tail or phantom per-core block)?
    needs_mask = (num_splits * chunks_per_core * tile_rows) != rows

    def in_map(c, j):
        # Clamp so a phantom tail block (odd chunk count on 2-TC chips)
        # re-reads a valid block; its contribution is masked out in-kernel.
        return (jnp.minimum(c * chunks_per_core + j, total_chunks - 1), 0)

    kernel = functools.partial(
        _mae_partial_kernel,
        rows=rows,
        tile_rows=tile_rows,
        chunks_per_core=chunks_per_core,
        needs_mask=needs_mask,
    )

    # 2 inputs x 2 pipeline buffers x tile bytes + slack for the tiny
    # accumulator / output / housekeeping.  Safely under physical VMEM on
    # v5e/v6e (128 MiB) and v7x (64 MiB).
    tile_bytes = tile_rows * _LANES * itemsize
    vmem_limit = int(4 * tile_bytes + 8 * 1024 * 1024)

    partials = pl.pallas_call(
        kernel,
        out_shape=jax.ShapeDtypeStruct((num_splits * 8, _LANES), jnp.float32),
        grid_spec=pltpu.PrefetchScalarGridSpec(
            num_scalar_prefetch=0,
            grid=(num_splits, chunks_per_core),
            in_specs=[
                pl.BlockSpec((tile_rows, _LANES), in_map),
                pl.BlockSpec((tile_rows, _LANES), in_map),
            ],
            out_specs=pl.BlockSpec((8, _LANES), lambda c, j: (c, 0)),
            scratch_shapes=[pltpu.VMEM((8, _LANES), jnp.float32)],
        ),
        compiler_params=pltpu.CompilerParams(
            dimension_semantics=("parallel", "arbitrary"),
            vmem_limit_bytes=vmem_limit,
        ),
    )(p2d, t2d)

    # Tiny finalize in XLA: sum per-core partials, divide by the true count.
    return jnp.sum(partials) / jnp.float32(n)


mae_loss = jax.jit(_mae_loss_impl)


if __name__ == "__main__":
    key = jax.random.PRNGKey(0)
    kp, kt = jax.random.split(key)
    pred = jax.random.normal(kp, (2, 4, 16, 16), dtype=jnp.float32)
    target = jax.random.normal(kt, (2, 4, 16, 16), dtype=jnp.float32)

    loss = mae_loss(pred, target)
    jax.block_until_ready(loss)

    ref = jnp.mean(jnp.abs(pred - target))
    assert jnp.allclose(loss, ref, rtol=1e-5, atol=1e-6), (loss, ref)
    print("KERNEL_OK")
</pallas_src>

<mosaic_0001>
module attributes {stable_mosaic.version = 11 : i64} {
  func.func @_mae_partial_kernel(%arg0: i32, %arg1: i32, %arg2: memref<16x128xf32, #tpu.memory_space<vmem>>, %arg3: memref<16x128xf32, #tpu.memory_space<vmem>>, %arg4: memref<8x128xf32, #tpu.memory_space<vmem>>, %arg5: memref<8x128xf32, #tpu.memory_space<vmem>>) attributes {dimension_semantics = [#tpu.dimension_semantics<parallel>, #tpu.dimension_semantics<arbitrary>], iteration_bounds = array<i64: 1, 1>, scalar_prefetch = 0 : i64, scratch_operands = 1 : i64, tpu.core_type = #tpu.core_type<tc>, window_params = [{transform_indices = @transform_0, window_bounds = array<i64: 16, 128>}, {transform_indices = @transform_1, window_bounds = array<i64: 16, 128>}, {transform_indices = @transform_2, window_bounds = array<i64: 8, 128>}]} {
    %c0_i32 = arith.constant 0 : i32
    %0 = arith.cmpi eq, %arg1, %c0_i32 : i32
    %1 = arith.extui %0 : i1 to i32
    %c0_i32_0 = arith.constant 0 : i32
    %2 = arith.cmpi ne, %1, %c0_i32_0 : i32
    scf.if %2 {
      %cst_10 = arith.constant 0.000000e+00 : f32
      %15 = vector.broadcast %cst_10 : f32 to vector<8x128xf32>
      %c0_11 = arith.constant 0 : index
      %c0_12 = arith.constant 0 : index
      %16 = vector.load %arg5[%c0_11, %c0_12] : memref<8x128xf32, #tpu.memory_space<vmem>>, vector<8x128xf32>
      tpu.vector_store %arg5[%c0_11, %c0_12], %15 {strides = array<i32>} : memref<8x128xf32, #tpu.memory_space<vmem>>, vector<8x128xf32>,
    } else {
    }
    %c0 = arith.constant 0 : index
    %c0_1 = arith.constant 0 : index
    %3 = vector.load %arg2[%c0, %c0_1] : memref<16x128xf32, #tpu.memory_space<vmem>>, vector<16x128xf32>
    %c0_2 = arith.constant 0 : index
    %c0_3 = arith.constant 0 : index
    %4 = vector.load %arg3[%c0_2, %c0_3] : memref<16x128xf32, #tpu.memory_space<vmem>>, vector<16x128xf32>
    %5 = arith.subf %3, %4 : vector<16x128xf32>
    %6 = math.absf %5 : vector<16x128xf32>
    %c0_4 = arith.constant 0 : index
    %c0_5 = arith.constant 0 : index
    %7 = vector.load %arg5[%c0_4, %c0_5] : memref<8x128xf32, #tpu.memory_space<vmem>>, vector<8x128xf32>
    %8 = vector.shape_cast %6 : vector<16x128xf32> to vector<2x8x128xf32>
    %cst = arith.constant dense<0.000000e+00> : vector<8x128xf32>
    %9 = vector.multi_reduction <add>, %8, %cst [0] : vector<2x8x128xf32> to vector<8x128xf32>
    %10 = arith.addf %7, %9 : vector<8x128xf32>
    %c0_6 = arith.constant 0 : index
    %c0_7 = arith.constant 0 : index
    %11 = vector.load %arg5[%c0_6, %c0_7] : memref<8x128xf32, #tpu.memory_space<vmem>>, vector<8x128xf32>
    tpu.vector_store %arg5[%c0_6, %c0_7], %10 {strides = array<i32>} : memref<8x128xf32, #tpu.memory_space<vmem>>, vector<8x128xf32>,
    %c0_i32_8 = arith.constant 0 : i32
    %12 = arith.cmpi eq, %arg1, %c0_i32_8 : i32
    %13 = arith.extui %12 : i1 to i32
    %c0_i32_9 = arith.constant 0 : i32
    %14 = arith.cmpi ne, %13, %c0_i32_9 : i32
    scf.if %14 {
      %c0_10 = arith.constant 0 : index
      %c0_11 = arith.constant 0 : index
      %15 = vector.load %arg5[%c0_10, %c0_11] : memref<8x128xf32, #tpu.memory_space<vmem>>, vector<8x128xf32>
      %c0_12 = arith.constant 0 : index
      %c0_13 = arith.constant 0 : index
      %16 = vector.load %arg4[%c0_12, %c0_13] : memref<8x128xf32, #tpu.memory_space<vmem>>, vector<8x128xf32>
      tpu.vector_store %arg4[%c0_12, %c0_13], %15 {strides = array<i32>} : memref<8x128xf32, #tpu.memory_space<vmem>>, vector<8x128xf32>,
    } else {
    }
    return
  }
  func.func @transform_0(%arg0: i32, %arg1: i32) -> (i32, i32) {
    %c1_i32 = arith.constant 1 : i32
    %0 = arith.muli %arg0, %c1_i32 : i32
    %1 = arith.addi %0, %arg1 : i32
    %c0_i32 = arith.constant 0 : i32
    %2 = arith.minsi %1, %c0_i32 : i32
    %c0_i32_0 = arith.constant 0 : i32
    %c0_i32_1 = arith.constant 0 : i32
    return %2, %c0_i32_0 : i32, i32
  }
  func.func @transform_1(%arg0: i32, %arg1: i32) -> (i32, i32) {
    %c1_i32 = arith.constant 1 : i32
    %0 = arith.muli %arg0, %c1_i32 : i32
    %1 = arith.addi %0, %arg1 : i32
    %c0_i32 = arith.constant 0 : i32
    %2 = arith.minsi %1, %c0_i32 : i32
    %c0_i32_0 = arith.constant 0 : i32
    %c0_i32_1 = arith.constant 0 : i32
    return %2, %c0_i32_0 : i32, i32
  }
  func.func @transform_2(%arg0: i32, %arg1: i32) -> (i32, i32) {
    %c0_i32 = arith.constant 0 : i32
    %c0_i32_0 = arith.constant 0 : i32
    return %arg0, %c0_i32 : i32, i32
  }
}

</mosaic_0001>

<bundles_post_ra>
// kernel: _mae_loss_impl.1
= control target key start
LH: loop header
LB: loop body
LE: loop exit
PB: predicated region body
PF: predicated region fallthrough
CT: control target
= control target key end

     0   :  { %s143_s0 = inlined_call_operand.vmem [shape: f32[16,128], index: 0, kind: input, shape index: {}]   ;;  %s144_s1 = inlined_call_operand.vmem [shape: f32[16,128], index: 1, kind: input, shape index: {}]   ;;  %s145_s2 = inlined_call_operand.vmem [shape: f32[8,128], index: 2, kind: output, shape index: {}]  }
   0x1   :  { %v80_v0 = vld [vmem:[%s143_s0] sm:$0xff]  ;;  %v81_v1 = vld [vmem:[%s143_s0 + $0x8] sm:$0xff] }
   0x2   :  { %v82_v2 = vld [vmem:[%s144_s1] sm:$0xff]  ;;  %v83_v3 = vld [vmem:[%s144_s1 + $0x8] sm:$0xff] }
   0x3   :  { %v84_v4 = vsub.f32 %v80_v0, %v82_v2  ;;  %v85_v5 = vsub.f32 %v81_v1, %v83_v3 }
   0x5   :  { %v86_v6 = vand.u32 2147483647, %v84_v4  ;;  %v87_v7 = vand.u32 2147483647, %v85_v5 }
   0x7   :  { %v89_v8 = vadd.f32 %v87_v7, %v86_v6 }
   0x9   :  { %96 = vst [vmem:[%s145_s2] sm:$0xff] %v89_v8 }

</bundles_post_ra>
